<compile_context>
chip_gen: v7x
topology: tpu7x:2x2x1
jax: 0.10.0
libtpu: 0.0.40
codegen_flags: <defaults>
</compile_context>

<pallas_src>
import math
import functools

import jax
import jax.numpy as jnp
from jax.experimental import pallas as pl
from jax.experimental.pallas import tpu as pltpu


def make_pos_embedding(emb_size: int, maxlen: int = 5000) -> jnp.ndarray:
    """Deterministic sin/cos table, identical to the PyTorch __init__."""
    den = jnp.exp(
        -jnp.arange(0, emb_size, 2, dtype=jnp.float32) * math.log(10000.0) / emb_size
    )
    pos = jnp.arange(0, maxlen, dtype=jnp.float32)[:, None]
    pe = jnp.zeros((maxlen, emb_size), jnp.float32)
    pe = pe.at[:, 0::2].set(jnp.sin(pos * den))
    pe = pe.at[:, 1::2].set(jnp.cos(pos * den))
    return pe  # (maxlen, E); the unsqueeze(-2) is handled by broadcasting


# ----------------------------- kernels --------------------------------------


def _broadcast_pe_lanes(pe, batch: int):
    # pe: (tq, E) -> (tq, batch*E), tiled along lanes. When E % 128 == 0 this
    # is just whole-vreg placement (no cross-lane permute).
    if batch == 1:
        return pe
    return jnp.concatenate([pe] * batch, axis=-1)


def _pe_eval_kernel(x_ref, pe_ref, o_ref, *, batch: int):
    # x_ref/o_ref: (tq, B*E)   pe_ref: (tq, E)
    pe = _broadcast_pe_lanes(pe_ref[...], batch)
    o_ref[...] = (x_ref[...] + pe).astype(o_ref.dtype)


def _pe_train_prng_kernel(seed_ref, x_ref, pe_ref, o_ref, *, batch: int,
                          threshold: int, scale: float):
    # In-kernel hardware PRNG: no dropout mask streamed from HBM.
    pltpu.prng_seed(seed_ref[0] + pl.program_id(0))
    bits = pltpu.bitcast(pltpu.prng_random_bits(x_ref.shape), jnp.uint32)
    pe = _broadcast_pe_lanes(pe_ref[...], batch)
    y = x_ref[...] + pe
    keep = bits >= jnp.uint32(threshold)          # keep prob = 1 - rate
    scaled = y * jnp.asarray(scale, y.dtype)
    o_ref[...] = jnp.where(keep, scaled, jnp.zeros_like(scaled)).astype(o_ref.dtype)


def _pe_train_bits_kernel(x_ref, pe_ref, bits_ref, o_ref, *, batch: int,
                          threshold: int, scale: float):
    # Portable fallback (non-TPU backends): streamed uint8 mask (4x cheaper
    # than the old uint32 mask).  Not used on TPU.
    pe = _broadcast_pe_lanes(pe_ref[...], batch)
    y = x_ref[...] + pe
    keep = bits_ref[...] >= jnp.uint8(threshold)
    scaled = y * jnp.asarray(scale, y.dtype)
    o_ref[...] = jnp.where(keep, scaled, jnp.zeros_like(scaled)).astype(o_ref.dtype)


# ----------------------------- wrapper ---------------------------------------


def _sublane_tile(itemsize: int) -> int:
    return {1: 32, 2: 16}.get(itemsize, 8)


def _choose_tq(S: int, row_bytes: int, sub: int,
               tile_target_bytes: int = 2 << 20) -> int:
    """Seq-tile length for (tq, B*E) blocks: ~2 MiB x tile, sublane-aligned,
    >= 2 grid steps when an aligned split exists, tq | S preferred."""
    row_bytes = max(1, row_bytes)
    tq = max(1, tile_target_bytes // row_bytes)
    if S >= 2 * sub:                       # let v7x's 2 TCs both stream
        tq = min(tq, pl.cdiv(S, 2))
    if S * row_bytes >= (16 << 20):        # big input: keep ~4 pipeline steps
        tq = min(tq, pl.cdiv(S, 4))
    if tq >= S:
        return S
    tq = max(sub, (tq // sub) * sub)       # dtype-native sublane alignment
    # Prefer a tq that divides S (keeps every pipeline step full width).
    t = tq
    while t >= sub:
        if S % t == 0:
            if 2 * t >= tq:
                tq = t
            break
        t -= sub
    return min(tq, S)


def positional_encoding(
    x: jnp.ndarray,              # (S, B, E)
    pos_embedding: jnp.ndarray,  # (maxlen, E)
    *,
    dropout_rate: float = 0.1,
    training: bool = False,
    rng_seed=None,               # required when training (int or int scalar)
    tq: int | None = None,
    in_kernel_rng: bool | None = None,
) -> jnp.ndarray:
    S, B, E = x.shape
    maxlen = pos_embedding.shape[0]
    if S > maxlen:
        raise ValueError(f"sequence length {S} exceeds pos-embedding maxlen {maxlen}")

    use_dropout = training and dropout_rate > 0.0
    if use_dropout and dropout_rate >= 1.0:
        return jnp.zeros_like(x)
    if in_kernel_rng is None:
        in_kernel_rng = jax.default_backend() == "tpu"

    # Cast the table once (outside the kernel) and slice to the used rows.
    pe = pos_embedding[:S].astype(x.dtype)          # (S, E)
    x2 = x.reshape(S, B * E)                        # lane-folded 2D view (free)

    itemsize = jnp.dtype(x.dtype).itemsize
    sub = _sublane_tile(itemsize)
    if use_dropout and not in_kernel_rng:
        sub = max(sub, 32)                          # uint8 mask sublane tile
    row_bytes = B * E * itemsize
    if tq is None:
        tq = _choose_tq(S, row_bytes, sub)
    tq = max(1, min(int(tq), S))
    grid = (pl.cdiv(S, tq),)

    x_spec = pl.BlockSpec((tq, B * E), lambda i: (i, 0))
    pe_spec = pl.BlockSpec((tq, E), lambda i: (i, 0))
    out_spec = pl.BlockSpec((tq, B * E), lambda i: (i, 0))
    out_shape = jax.ShapeDtypeStruct((S, B * E), x.dtype)

    # VMEM budget (double-buffered x/out/pe [+ mask]); only raise the scoped
    # limit when the working set would not fit v5e's 16 MiB default.
    tile_x = tq * row_bytes
    tile_pe = tq * E * itemsize
    tile_bits = tq * B * E if (use_dropout and not in_kernel_rng) else 0
    est = 2 * (2 * tile_x + tile_pe + tile_bits) + (1 << 20)
    cp_kwargs = dict(dimension_semantics=("parallel",))
    if est > (14 << 20):
        cp_kwargs["vmem_limit_bytes"] = int(min(est, 64 << 20))
    cparams = pltpu.CompilerParams(**cp_kwargs)

    if not use_dropout:
        out2 = pl.pallas_call(
            functools.partial(_pe_eval_kernel, batch=B),
            grid=grid,
            in_specs=[x_spec, pe_spec],
            out_specs=out_spec,
            out_shape=out_shape,
            compiler_params=cparams,
        )(x2, pe)
        return out2.reshape(S, B, E)

    if rng_seed is None:
        raise ValueError("training=True requires an explicit rng_seed")
    p = float(dropout_rate)
    scale = 1.0 / (1.0 - p)

    if in_kernel_rng:
        threshold = min(max(int(p * 4294967296.0), 0), 4294967295)
        seed_arr = jnp.atleast_1d(jnp.asarray(rng_seed, dtype=jnp.int32))
        seed_spec = pl.BlockSpec(memory_space=pltpu.MemorySpace.SMEM)
        kernel = functools.partial(
            _pe_train_prng_kernel, batch=B, threshold=threshold, scale=scale
        )
        out2 = pl.pallas_call(
            kernel,
            grid=grid,
            in_specs=[seed_spec, x_spec, pe_spec],
            out_specs=out_spec,
            out_shape=out_shape,
            compiler_params=cparams,
        )(seed_arr, x2, pe)
    else:
        # TODO(synk): fallback only for non-TPU / interpret runs; on TPU the
        # in-kernel PRNG path above is always taken.
        threshold8 = min(max(int(round(p * 256.0)), 0), 255)
        key = jax.random.PRNGKey(rng_seed)
        bits = jax.random.bits(key, (S, B * E), dtype=jnp.uint8)
        bits_spec = pl.BlockSpec((tq, B * E), lambda i: (i, 0))
        kernel = functools.partial(
            _pe_train_bits_kernel, batch=B, threshold=threshold8, scale=scale
        )
        out2 = pl.pallas_call(
            kernel,
            grid=grid,
            in_specs=[x_spec, pe_spec, bits_spec],
            out_specs=out_spec,
            out_shape=out_shape,
            compiler_params=cparams,
        )(x2, pe, bits)
    return out2.reshape(S, B, E)


# ----------------------------- demo / checks ---------------------------------


if __name__ == "__main__":
    S, B, E = 8, 2, 32
    maxlen = 5000
    dropout = 0.1

    kx = jax.random.PRNGKey(0)
    x = jax.random.normal(kx, (S, B, E), dtype=jnp.float32)
    pe_table = make_pos_embedding(E, maxlen)

    # eval-mode forward (dropout == identity) -> exact check vs reference
    out_eval = positional_encoding(x, pe_table, dropout_rate=dropout, training=False)
    out_eval = jax.block_until_ready(out_eval)

    ref = x + pe_table[:S][:, None, :]
    assert out_eval.shape == (S, B, E)
    assert jnp.allclose(out_eval, ref, atol=1e-6, rtol=1e-6), "eval mismatch"

    # training-mode forward (stochastic dropout) -> sanity checks:
    # surviving elements must equal ref / (1 - p); dropped elements are 0
    out_train = positional_encoding(
        x, pe_table, dropout_rate=dropout, training=True, rng_seed=123
    )
    out_train = jax.block_until_ready(out_train)
    scaled_ref = ref / (1.0 - dropout)
    match = jnp.isclose(out_train, scaled_ref, atol=1e-5, rtol=1e-5) | (out_train == 0.0)
    assert bool(jnp.all(match)), "train-mode dropout mismatch"

    print("KERNEL_OK")
</pallas_src>

<mosaic_0001>
module attributes {stable_mosaic.version = 11 : i64} {
  func.func @_pe_eval_kernel(%arg0: i32, %arg1: memref<8x64xf32, #tpu.memory_space<vmem>>, %arg2: memref<8x32xf32, #tpu.memory_space<vmem>>, %arg3: memref<8x64xf32, #tpu.memory_space<vmem>>) attributes {dimension_semantics = [#tpu.dimension_semantics<parallel>], iteration_bounds = array<i64: 1>, scalar_prefetch = 0 : i64, scratch_operands = 0 : i64, tpu.core_type = #tpu.core_type<tc>, window_params = [{transform_indices = @transform_0, window_bounds = array<i64: 8, 64>}, {transform_indices = @transform_1, window_bounds = array<i64: 8, 32>}, {transform_indices = @transform_2, window_bounds = array<i64: 8, 64>}]} {
    %c0 = arith.constant 0 : index
    %c0_0 = arith.constant 0 : index
    %0 = vector.load %arg2[%c0, %c0_0] : memref<8x32xf32, #tpu.memory_space<vmem>>, vector<8x32xf32>
    %1 = tpu.concatenate %0, %0 in 1 : vector<8x32xf32>, vector<8x32xf32> -> vector<8x64xf32>
    %c0_1 = arith.constant 0 : index
    %c0_2 = arith.constant 0 : index
    %2 = vector.load %arg1[%c0_1, %c0_2] : memref<8x64xf32, #tpu.memory_space<vmem>>, vector<8x64xf32>
    %3 = arith.addf %2, %1 : vector<8x64xf32>
    %c0_3 = arith.constant 0 : index
    %c0_4 = arith.constant 0 : index
    %4 = vector.load %arg3[%c0_3, %c0_4] : memref<8x64xf32, #tpu.memory_space<vmem>>, vector<8x64xf32>
    tpu.vector_store %arg3[%c0_3, %c0_4], %3 {strides = array<i32>} : memref<8x64xf32, #tpu.memory_space<vmem>>, vector<8x64xf32>,
    return
  }
  func.func @transform_0(%arg0: i32) -> (i32, i32) {
    %c0_i32 = arith.constant 0 : i32
    %c0_i32_0 = arith.constant 0 : i32
    return %arg0, %c0_i32 : i32, i32
  }
  func.func @transform_1(%arg0: i32) -> (i32, i32) {
    %c0_i32 = arith.constant 0 : i32
    %c0_i32_0 = arith.constant 0 : i32
    return %arg0, %c0_i32 : i32, i32
  }
  func.func @transform_2(%arg0: i32) -> (i32, i32) {
    %c0_i32 = arith.constant 0 : i32
    %c0_i32_0 = arith.constant 0 : i32
    return %arg0, %c0_i32 : i32, i32
  }
}

</mosaic_0001>

<bundles_post_ra>
// kernel: tpu_custom_call.1
= control target key start
LH: loop header
LB: loop body
LE: loop exit
PB: predicated region body
PF: predicated region fallthrough
CT: control target
= control target key end

     0   :  { %7 = vsyncpa [#allocation3], 0  ;;  %s194_s0 = inlined_call_operand.hbm [shape: f32[8,64], index: 0, kind: input, shape index: {}]   ;;  %s195_s1 = inlined_call_operand.hbm [shape: f32[8,32], index: 1, kind: input, shape index: {}]   ;;  %s196_s2 = inlined_call_operand.hbm [shape: f32[8,64], index: 2, kind: output, shape index: {}]  }
   0x1   :  { %8 = vsyncpa [#allocation6], 0 }
   0x2   :  { %9 = vsyncpa [#allocation4], 0  ;;  %s139_s9 = smov [#allocation2]   ;;  %s140_s11 = smov [#allocation5]  }
   0x3   :  { %s16_s10 = sshll.u32 %s139_s9, 4  ;;  %s26_s12 = sshll.u32 %s140_s11, 4  ;;  %s17_s10 = int_to_ptr.vmem [resolvable:$true] %s16_s10  ;;  %s27_s12 = int_to_ptr.vmem [resolvable:$true] %s26_s12 }
   0x4   :  { %s67_s15 = scalar_lea.hbm %s194_s0, 128 }
   0x5   :  { %p68_p0 = scmp.ne.s32.totalorder %s194_s0, %s67_s15  ;;  %p71_p1 = scmp.lt.u32.totalorder %s67_s15, %s194_s0 }
   0x7   :  { %p73_p2 = pnand %p71_p1, %p68_p0 }
   0x9   :  { %76 = shalt.err (!%p73_p2)
}
   0xa   :  { %s77_s20 = scalar_lea.vmem %s17_s10, 128  ;;  %p82_p4 = scmp.lt.s32.totalorder %s17_s10, %s17_s10 }
   0xb   :  { %p78_p3 = scmp.ne.s32.totalorder %s17_s10, %s77_s20  ;;  %p83_p5 = scmp.lt.s32.totalorder %s77_s20, %s77_s20 }
   0xd   :  { %p84_p6 = por %p83_p5, %p82_p4 }
   0xf   :  { %p85_p7 = pnand %p84_p6, %p78_p3 }
  0x11   :  { %88 = shalt.err (!%p85_p7)
}
  0x12   :  { %19 = dma.hbm_to_vmem [thread:$0]  %s194_s0, 128, %s17_s10, [#allocation3]  }
  0x13   :  { %s89_s25 = scalar_lea.hbm %s195_s1, 128 }
  0x14   :  { %p90_p8 = scmp.ne.s32.totalorder %s195_s1, %s89_s25  ;;  %p93_p9 = scmp.lt.u32.totalorder %s89_s25, %s195_s1 }
  0x16   :  { %p95_p10 = pnand %p93_p9, %p90_p8 }
  0x18   :  { %98 = shalt.err (!%p95_p10)
}
  0x19   :  { %s99_s30 = scalar_lea.vmem %s27_s12, 128  ;;  %p104_p12 = scmp.lt.s32.totalorder %s27_s12, %s27_s12 }
  0x1a   :  { %p100_p11 = scmp.ne.s32.totalorder %s27_s12, %s99_s30  ;;  %p105_p13 = scmp.lt.s32.totalorder %s99_s30, %s99_s30 }
  0x1c   :  { %p106_p0 = por %p105_p13, %p104_p12 }
  0x1e   :  { %p107_p1 = pnand %p106_p0, %p100_p11 }
  0x20   :  { %110 = shalt.err (!%p107_p1)
}
  0x21   :  { %29 = dma.hbm_to_vmem [thread:$0]  %s195_s1, 128, %s27_s12, [#allocation6]  }
  0x22   :  { %133 = dma.done.wait [#allocation3], 128  }
  0x23   :  { %134 = vsyncadd [#allocation3], 4294967168 }
  0x24   :  { %135 = dma.done.wait [#allocation6], 128  }
  0x25   :  { %136 = vsyncadd [#allocation6], 4294967168  ;;  %v36_v0 = vld [vmem:[#allocation5] sm:$0xff]  ;;  %s141_s4 = smov 32   ;;  %vm41_vm0 = vcmask 261120   ;;  %v43_v1 = vld [vmem:[#allocation2] sm:$0xff] }
  0x26   :  { %38 = vrot.lane.b32.xlu0 %v36_v0, %s141_s4  ;;  %s142_s5 = smov [#allocation7]   ;;  %vm45_vm1 = vcmask 523264  }
  0x27   :  { %s53_s6 = sshll.u32 %s142_s5, 4  ;;  %s54_s6 = int_to_ptr.vmem [resolvable:$true] %s53_s6 }
  0x28   :  { %s111_s7 = scalar_lea.vmem %s54_s6, 128  ;;  %p116_p3 = scmp.lt.s32.totalorder %s54_s6, %s54_s6 }
  0x29   :  { %p112_p2 = scmp.ne.s32.totalorder %s54_s6, %s111_s7  ;;  %p117_p4 = scmp.lt.s32.totalorder %s111_s7, %s111_s7 }
  0x2b   :  { %p118_p5 = por %p117_p4, %p116_p3 }
  0x2d   :  { %p119_p6 = pnand %p118_p5, %p112_p2 }
  0x98   :  { %v39_v2 = vpop.permute.xlu0 %38 }
  0x99   :  { %v42_v3 = vsel %vm41_vm0, %v36_v0, %v39_v2 }
  0x9a   :  { %v44_v4 = vadd.f32 %v43_v1, %v42_v3 }
  0x9c   :  { %46 = vst.msk [vmem:[#allocation7] sm:$0xff] %vm45_vm1, %v44_v4 }
  0x9d   :  { %122 = shalt.err (!%p119_p6)
}
  0x9e   :  { %s123_s9 = scalar_lea.hbm %s196_s2, 128 }
  0x9f   :  { %p124_p7 = scmp.ne.s32.totalorder %s196_s2, %s123_s9  ;;  %p127_p8 = scmp.lt.u32.totalorder %s123_s9, %s196_s2 }
  0xa1   :  { %p129_p9 = pnand %p127_p8, %p124_p7 }
  0xa3   :  { %132 = shalt.err (!%p129_p9)
}
  0xa4   :  { %56 = dma.vmem_to_hbm [thread:$0]  %s54_s6, 128, %s196_s2, [#allocation4]  }
  0xa5   :  { %137 = dma.done.wait [#allocation4], 128  }
  0xa6   :  { %138 = vsyncadd [#allocation4], 4294967168 }
  0xa7   :  { %60 = vsyncpa [#allocation3], 1 }
  0xa8   :  { %61 = vsyncpa [#allocation6], 1 }
  0xa9   :  { %62 = vsyncpa [#allocation4], 1 }

</bundles_post_ra>
